<compile_context>
chip_gen: v6e
topology: v6e:2x2x1
jax: 0.10.0
libtpu: 0.0.40
codegen_flags: <defaults>
</compile_context>

<pallas_src>
import functools

import jax
import jax.numpy as jnp
from jax import lax
from jax.experimental import pallas as pl
from jax.experimental.pallas import tpu as pltpu


def _debayer_kernel(x_ref, top_ref, bot_ref, o_ref, *, clamp_right):
    """One (batch, row-tile) grid step.

    x_ref   : (1, 1, TH, W) auto-pipelined input row tile (VMEM)
    top_ref : (1, 1, 8,  W) 8-row block containing the row above the tile
    bot_ref : (1, 1, 8,  W) 8-row block containing the row below the tile
    o_ref   : (1, 3, TH, W) auto-pipelined RGB output tile
    """
    h = pl.program_id(1)
    nh = pl.num_programs(1)

    x = x_ref[0, 0]                                   # (TH, W)
    TH, W = x.shape

    # Halo rows.  For interior seams the clamped halo block is the true
    # neighbouring 8-row block: row above = its last row, row below = its first
    # row.  At the image top/bottom the index_map clamps to the edge block and
    # we pick the replicate row instead (row 0 / row TH-mapped last row).
    top_blk = top_ref[0, 0]                           # (8, W)
    bot_blk = bot_ref[0, 0]                           # (8, W)
    top_row = jnp.where(h == 0, top_blk[0:1, :], top_blk[7:8, :])        # (1, W)
    bot_row = jnp.where(h == nh - 1, bot_blk[7:8, :], bot_blk[0:1, :])   # (1, W)

    col = lax.broadcasted_iota(jnp.int32, (1, W), 1)
    row = lax.broadcasted_iota(jnp.int32, (TH, 1), 0)
    col_first = col == 0

    def lr_of(a):
        # left + right neighbours; replicate clamp at the true left border,
        # and at the right border only when W was not padded (padded columns
        # are sliced off by the wrapper, so their wrap-around garbage is moot).
        n = a.shape[1]
        left = jnp.where(col_first, a, pltpu.roll(a, 1, axis=1))
        right = pltpu.roll(a, n - 1, axis=1)          # == roll by -1 (circular)
        if clamp_right:
            right = jnp.where(col == (n - 1), a, right)
        return left + right

    lr = lr_of(x)                                     # left + right      (TH, W)
    c3 = 0.5 * lr                                     # horizontal kernel

    lr_top = lr_of(top_row)                           # (1, W)
    lr_bot = lr_of(bot_row)                           # (1, W)

    row_first = row == 0
    row_last = row == (TH - 1)
    up = jnp.where(row_first, top_row, pltpu.roll(x, 1, axis=0))
    down = jnp.where(row_last, bot_row, pltpu.roll(x, TH - 1, axis=0))
    ud = up + down
    c4 = 0.5 * ud                                     # vertical kernel
    c1 = 0.25 * (lr + ud)                             # plus / cross kernel

    up_lr = jnp.where(row_first, lr_top, pltpu.roll(lr, 1, axis=0))
    down_lr = jnp.where(row_last, lr_bot, pltpu.roll(lr, TH - 1, axis=0))
    c2 = 0.25 * (up_lr + down_lr)                     # diagonal kernel
    c0 = x                                            # identity kernel

    # Bayer parity (TH and the tile row offset are even, so local == global).
    row_even = (row & 1) == 0                         # (TH, 1)
    col_even = (col & 1) == 0                         # (1, W)

    # Channel gather per 2x2 cell:
    #   R: [[0,3],[4,2]]  G: [[1,0],[0,1]]  B: [[2,4],[3,0]]
    # Hierarchical selects (column parity inside, row parity outside) and
    # per-channel compute -> store interleave.
    r_ch = jnp.where(row_even,
                     jnp.where(col_even, c0, c3),
                     jnp.where(col_even, c4, c2))
    o_ref[0, 0] = r_ch.astype(o_ref.dtype)

    g_ch = jnp.where(row_even == col_even, c1, c0)
    o_ref[0, 1] = g_ch.astype(o_ref.dtype)

    b_ch = jnp.where(row_even,
                     jnp.where(col_even, c2, c4),
                     jnp.where(col_even, c3, c0))
    o_ref[0, 2] = b_ch.astype(o_ref.dtype)


def _round_up(v, m):
    return (v + m - 1) // m * m


@functools.partial(jax.jit, static_argnames=("tile_h",))
def debayer3x3(x, *, tile_h=None):
    """x: (B, 1, H, W) Bayer image (BG layout) -> (B, 3, H, W) RGB.

    tile_h: row-tile height (multiple of 8).  None -> auto (generation-aware).
    """
    B, C, H, W = x.shape
    assert C == 1 and H % 2 == 0 and W % 2 == 0
    # TODO(synk): narrow-dtype (uint8/uint16) I/O path not implemented; this
    # kernel assumes a float dtype (tested with float32).

    # Lane-dense output: pad W to a multiple of 128.
    Wp = _round_up(W, 128)
    itemsize = x.dtype.itemsize

    # Generation-aware VMEM budget (85% of physical VMEM; conservative
    # fallback when hardware info is unavailable, e.g. interpret mode).
    try:
        vmem_cap = int(pltpu.get_tpu_info().vmem_capacity_bytes)
    except Exception:
        vmem_cap = 64 * 1024 * 1024
    vmem_budget = int(0.85 * vmem_cap)

    # Tile height: 256 on 128-MiB-VMEM parts (v5e/v6e), 128 otherwise (v7x),
    # always a multiple of 8; shrink until ~24 working slabs of th*Wp fit.
    if tile_h is None:
        th = 256 if vmem_cap >= 96 * 1024 * 1024 else 128
    else:
        th = max(8, _round_up(tile_h, 8))
    while th > 8 and 24 * th * Wp * itemsize > vmem_budget:
        th = max(8, _round_up(th // 2, 8))
    th = min(th, _round_up(H, 8))

    # Pad H up to a multiple of th (edge padding preserves replicate-border
    # semantics for retained pixels and does not change their Bayer parity).
    Hp = _round_up(H, th)
    pad_h = Hp - H
    pad_w = Wp - W
    xp = x
    if pad_h or pad_w:
        xp = jnp.pad(x, ((0, 0), (0, 0), (0, pad_h), (0, pad_w)), mode="edge")

    nbh = th // 8          # 8-row blocks per tile
    nbt = Hp // 8          # total 8-row blocks in the (padded) image

    slab = th * Wp * itemsize
    vmem_limit = int(min(vmem_budget,
                         max(32 * 1024 * 1024, 24 * slab + 8 * 8 * Wp * itemsize)))

    kernel = functools.partial(_debayer_kernel, clamp_right=(pad_w == 0))

    out = pl.pallas_call(
        kernel,
        out_shape=jax.ShapeDtypeStruct((B, 3, Hp, Wp), x.dtype),
        grid_spec=pltpu.PrefetchScalarGridSpec(
            num_scalar_prefetch=0,
            grid=(B, Hp // th),
            in_specs=[
                # Main row tile.
                pl.BlockSpec((1, 1, th, Wp), lambda b, h: (b, 0, h, 0)),
                # 8-row block just above the tile (clamped at the image top).
                pl.BlockSpec((1, 1, 8, Wp),
                             lambda b, h: (b, 0, jnp.maximum(h * nbh - 1, 0), 0)),
                # 8-row block just below the tile (clamped at the image bottom).
                pl.BlockSpec((1, 1, 8, Wp),
                             lambda b, h: (b, 0, jnp.minimum((h + 1) * nbh, nbt - 1), 0)),
            ],
            out_specs=pl.BlockSpec((1, 3, th, Wp), lambda b, h: (b, 0, h, 0)),
        ),
        compiler_params=pltpu.CompilerParams(
            dimension_semantics=("parallel", "parallel"),
            vmem_limit_bytes=vmem_limit,
        ),
    )(xp, xp, xp)   # same array; operands alias one HBM buffer (no copies)

    if pad_h or pad_w:
        out = out[:, :, :H, :W]
    return out


def _reference(x):
    """Pure-JAX reference mirroring the PyTorch forward."""
    B, _, H, W = x.shape
    xp = jnp.pad(x, ((0, 0), (0, 0), (1, 1), (1, 1)), mode="edge")[:, 0]
    center = xp[:, 1:-1, 1:-1]
    up, down = xp[:, :-2, 1:-1], xp[:, 2:, 1:-1]
    left, right = xp[:, 1:-1, :-2], xp[:, 1:-1, 2:]
    ul, ur = xp[:, :-2, :-2], xp[:, :-2, 2:]
    dl, dr = xp[:, 2:, :-2], xp[:, 2:, 2:]
    c = jnp.stack([
        center,
        0.25 * (up + down + left + right),
        0.25 * (ul + ur + dl + dr),
        0.5 * (left + right),
        0.5 * (up + down),
    ], axis=1)  # (B, 5, H, W)
    idx = jnp.array([[[0, 3], [4, 2]],
                     [[1, 0], [0, 1]],
                     [[2, 4], [3, 0]]], dtype=jnp.int32)       # (3, 2, 2)
    idx_full = jnp.tile(idx, (1, H // 2, W // 2))[None]
    idx_full = jnp.broadcast_to(idx_full, (B, 3, H, W))
    return jnp.take_along_axis(c, idx_full, axis=1)


if __name__ == "__main__":
    key = jax.random.PRNGKey(0)
    k1, k2, k3 = jax.random.split(key, 3)

    # Test 1: B > 1, lane-dense W, multiple row tiles (exercises tile seams).
    x1 = jax.random.uniform(k1, (2, 1, 16, 256), dtype=jnp.float32)
    out1 = jax.block_until_ready(debayer3x3(x1, tile_h=8))
    ref1 = _reference(x1)
    assert out1.shape == (2, 3, 16, 256)
    assert jnp.allclose(out1, ref1, atol=1e-5), "mismatch vs reference (test 1)"

    # Test 2: W not a multiple of 128 (pad/slice path) + interior seams.
    x2 = jax.random.uniform(k2, (1, 1, 32, 160), dtype=jnp.float32)
    out2 = jax.block_until_ready(debayer3x3(x2, tile_h=16))
    ref2 = _reference(x2)
    assert out2.shape == (1, 3, 32, 160)
    assert jnp.allclose(out2, ref2, atol=1e-5), "mismatch vs reference (test 2)"

    # Test 3: default (auto) tile height, H not a multiple of the tile.
    x3 = jax.random.uniform(k3, (1, 1, 24, 128), dtype=jnp.float32)
    out3 = jax.block_until_ready(debayer3x3(x3))
    ref3 = _reference(x3)
    assert out3.shape == (1, 3, 24, 128)
    assert jnp.allclose(out3, ref3, atol=1e-5), "mismatch vs reference (test 3)"

    print("KERNEL_OK")
</pallas_src>

<mosaic_0001>
module attributes {stable_mosaic.version = 11 : i64} {
  func.func @_debayer_kernel(%arg0: i32, %arg1: i32, %arg2: memref<1x1x8x256xf32, #tpu.memory_space<vmem>>, %arg3: memref<1x1x8x256xf32, #tpu.memory_space<vmem>>, %arg4: memref<1x1x8x256xf32, #tpu.memory_space<vmem>>, %arg5: memref<1x3x8x256xf32, #tpu.memory_space<vmem>>) attributes {dimension_semantics = [#tpu.dimension_semantics<parallel>, #tpu.dimension_semantics<parallel>], iteration_bounds = array<i64: 2, 2>, scalar_prefetch = 0 : i64, scratch_operands = 0 : i64, tpu.core_type = #tpu.core_type<tc>, window_params = [{transform_indices = @transform_0, window_bounds = array<i64: 1, 1, 8, 256>}, {transform_indices = @transform_1, window_bounds = array<i64: 1, 1, 8, 256>}, {transform_indices = @transform_2, window_bounds = array<i64: 1, 1, 8, 256>}, {transform_indices = @transform_3, window_bounds = array<i64: 1, 3, 8, 256>}]} {
    %c0 = arith.constant 0 : index
    %c0_0 = arith.constant 0 : index
    %c0_1 = arith.constant 0 : index
    %c0_2 = arith.constant 0 : index
    %0 = vector.load %arg2[%c0, %c0_0, %c0_1, %c0_2] : memref<1x1x8x256xf32, #tpu.memory_space<vmem>>, vector<1x1x8x256xf32>
    %1 = vector.shape_cast %0 : vector<1x1x8x256xf32> to vector<8x256xf32>
    %c0_3 = arith.constant 0 : index
    %c0_4 = arith.constant 0 : index
    %c0_5 = arith.constant 0 : index
    %c0_6 = arith.constant 0 : index
    %2 = vector.load %arg3[%c0_3, %c0_4, %c0_5, %c0_6] : memref<1x1x8x256xf32, #tpu.memory_space<vmem>>, vector<1x1x8x256xf32>
    %3 = vector.shape_cast %2 : vector<1x1x8x256xf32> to vector<8x256xf32>
    %c0_7 = arith.constant 0 : index
    %c0_8 = arith.constant 0 : index
    %c0_9 = arith.constant 0 : index
    %c0_10 = arith.constant 0 : index
    %4 = vector.load %arg4[%c0_7, %c0_8, %c0_9, %c0_10] : memref<1x1x8x256xf32, #tpu.memory_space<vmem>>, vector<1x1x8x256xf32>
    %5 = vector.shape_cast %4 : vector<1x1x8x256xf32> to vector<8x256xf32>
    %c0_i32 = arith.constant 0 : i32
    %6 = arith.cmpi eq, %arg1, %c0_i32 : i32
    %7 = vector.extract_strided_slice %3 {offsets = [0, 0], sizes = [1, 256], strides = [1, 1]} : vector<8x256xf32> to vector<1x256xf32>
    %8 = vector.extract_strided_slice %3 {offsets = [7, 0], sizes = [1, 256], strides = [1, 1]} : vector<8x256xf32> to vector<1x256xf32>
    %9 = arith.select %6, %7, %8 : vector<1x256xf32>
    %c1_i32 = arith.constant 1 : i32
    %10 = arith.cmpi eq, %arg1, %c1_i32 : i32
    %11 = vector.extract_strided_slice %5 {offsets = [7, 0], sizes = [1, 256], strides = [1, 1]} : vector<8x256xf32> to vector<1x256xf32>
    %12 = vector.extract_strided_slice %5 {offsets = [0, 0], sizes = [1, 256], strides = [1, 1]} : vector<8x256xf32> to vector<1x256xf32>
    %13 = arith.select %10, %11, %12 : vector<1x256xf32>
    %14 = tpu.iota {dimensions = array<i32: 1>} : vector<1x256xi32>
    %15 = tpu.iota {dimensions = array<i32: 0>} : vector<8x1xi32>
    %c0_i32_11 = arith.constant 0 : i32
    %16 = vector.broadcast %c0_i32_11 : i32 to vector<1x256xi32>
    %17 = arith.cmpi eq, %14, %16 : vector<1x256xi32>
    %c1_i32_12 = arith.constant 1 : i32
    %18 = tpu.dynamic_rotate %1 by %c1_i32_12 dim 1 : vector<8x256xf32>, i32 -> vector<8x256xf32>
    %19 = vector.shape_cast %17 : vector<1x256xi1> to vector<1x256xi1>
    %20 = vector.broadcast %19 : vector<1x256xi1> to vector<8x256xi1>
    %21 = arith.select %20, %1, %18 : vector<8x256xi1>, vector<8x256xf32>
    %c255_i32 = arith.constant 255 : i32
    %22 = tpu.dynamic_rotate %1 by %c255_i32 dim 1 : vector<8x256xf32>, i32 -> vector<8x256xf32>
    %c255_i32_13 = arith.constant 255 : i32
    %23 = vector.broadcast %c255_i32_13 : i32 to vector<1x256xi32>
    %24 = arith.cmpi eq, %14, %23 : vector<1x256xi32>
    %25 = vector.shape_cast %24 : vector<1x256xi1> to vector<1x256xi1>
    %26 = vector.broadcast %25 : vector<1x256xi1> to vector<8x256xi1>
    %27 = arith.select %26, %1, %22 : vector<8x256xi1>, vector<8x256xf32>
    %28 = arith.addf %21, %27 : vector<8x256xf32>
    %cst = arith.constant 5.000000e-01 : f32
    %29 = vector.broadcast %cst : f32 to vector<8x256xf32>
    %30 = arith.mulf %29, %28 : vector<8x256xf32>
    %c1_i32_14 = arith.constant 1 : i32
    %31 = tpu.dynamic_rotate %9 by %c1_i32_14 dim 1 : vector<1x256xf32>, i32 -> vector<1x256xf32>
    %32 = arith.select %17, %9, %31 : vector<1x256xi1>, vector<1x256xf32>
    %c255_i32_15 = arith.constant 255 : i32
    %33 = tpu.dynamic_rotate %9 by %c255_i32_15 dim 1 : vector<1x256xf32>, i32 -> vector<1x256xf32>
    %c255_i32_16 = arith.constant 255 : i32
    %34 = vector.broadcast %c255_i32_16 : i32 to vector<1x256xi32>
    %35 = arith.cmpi eq, %14, %34 : vector<1x256xi32>
    %36 = arith.select %35, %9, %33 : vector<1x256xi1>, vector<1x256xf32>
    %37 = arith.addf %32, %36 : vector<1x256xf32>
    %c1_i32_17 = arith.constant 1 : i32
    %38 = tpu.dynamic_rotate %13 by %c1_i32_17 dim 1 : vector<1x256xf32>, i32 -> vector<1x256xf32>
    %39 = arith.select %17, %13, %38 : vector<1x256xi1>, vector<1x256xf32>
    %c255_i32_18 = arith.constant 255 : i32
    %40 = tpu.dynamic_rotate %13 by %c255_i32_18 dim 1 : vector<1x256xf32>, i32 -> vector<1x256xf32>
    %c255_i32_19 = arith.constant 255 : i32
    %41 = vector.broadcast %c255_i32_19 : i32 to vector<1x256xi32>
    %42 = arith.cmpi eq, %14, %41 : vector<1x256xi32>
    %43 = arith.select %42, %13, %40 : vector<1x256xi1>, vector<1x256xf32>
    %44 = arith.addf %39, %43 : vector<1x256xf32>
    %c0_i32_20 = arith.constant 0 : i32
    %45 = vector.broadcast %c0_i32_20 : i32 to vector<8x1xi32>
    %46 = arith.cmpi eq, %15, %45 : vector<8x1xi32>
    %c7_i32 = arith.constant 7 : i32
    %47 = vector.broadcast %c7_i32 : i32 to vector<8x1xi32>
    %48 = arith.cmpi eq, %15, %47 : vector<8x1xi32>
    %c1_i32_21 = arith.constant 1 : i32
    %49 = tpu.dynamic_rotate %1 by %c1_i32_21 dim 0 : vector<8x256xf32>, i32 -> vector<8x256xf32>
    %50 = vector.shape_cast %46 : vector<8x1xi1> to vector<8x1xi1>
    %51 = vector.broadcast %50 : vector<8x1xi1> to vector<8x256xi1>
    %52 = vector.shape_cast %9 : vector<1x256xf32> to vector<1x256xf32>
    %53 = vector.broadcast %52 : vector<1x256xf32> to vector<8x256xf32>
    %54 = arith.select %51, %53, %49 : vector<8x256xi1>, vector<8x256xf32>
    %c7_i32_22 = arith.constant 7 : i32
    %55 = tpu.dynamic_rotate %1 by %c7_i32_22 dim 0 : vector<8x256xf32>, i32 -> vector<8x256xf32>
    %56 = vector.shape_cast %48 : vector<8x1xi1> to vector<8x1xi1>
    %57 = vector.broadcast %56 : vector<8x1xi1> to vector<8x256xi1>
    %58 = vector.shape_cast %13 : vector<1x256xf32> to vector<1x256xf32>
    %59 = vector.broadcast %58 : vector<1x256xf32> to vector<8x256xf32>
    %60 = arith.select %57, %59, %55 : vector<8x256xi1>, vector<8x256xf32>
    %61 = arith.addf %54, %60 : vector<8x256xf32>
    %cst_23 = arith.constant 5.000000e-01 : f32
    %62 = vector.broadcast %cst_23 : f32 to vector<8x256xf32>
    %63 = arith.mulf %62, %61 : vector<8x256xf32>
    %64 = arith.addf %28, %61 : vector<8x256xf32>
    %cst_24 = arith.constant 2.500000e-01 : f32
    %65 = vector.broadcast %cst_24 : f32 to vector<8x256xf32>
    %66 = arith.mulf %65, %64 : vector<8x256xf32>
    %c1_i32_25 = arith.constant 1 : i32
    %67 = tpu.dynamic_rotate %28 by %c1_i32_25 dim 0 : vector<8x256xf32>, i32 -> vector<8x256xf32>
    %68 = vector.shape_cast %46 : vector<8x1xi1> to vector<8x1xi1>
    %69 = vector.broadcast %68 : vector<8x1xi1> to vector<8x256xi1>
    %70 = vector.shape_cast %37 : vector<1x256xf32> to vector<1x256xf32>
    %71 = vector.broadcast %70 : vector<1x256xf32> to vector<8x256xf32>
    %72 = arith.select %69, %71, %67 : vector<8x256xi1>, vector<8x256xf32>
    %c7_i32_26 = arith.constant 7 : i32
    %73 = tpu.dynamic_rotate %28 by %c7_i32_26 dim 0 : vector<8x256xf32>, i32 -> vector<8x256xf32>
    %74 = vector.shape_cast %48 : vector<8x1xi1> to vector<8x1xi1>
    %75 = vector.broadcast %74 : vector<8x1xi1> to vector<8x256xi1>
    %76 = vector.shape_cast %44 : vector<1x256xf32> to vector<1x256xf32>
    %77 = vector.broadcast %76 : vector<1x256xf32> to vector<8x256xf32>
    %78 = arith.select %75, %77, %73 : vector<8x256xi1>, vector<8x256xf32>
    %79 = arith.addf %72, %78 : vector<8x256xf32>
    %cst_27 = arith.constant 2.500000e-01 : f32
    %80 = vector.broadcast %cst_27 : f32 to vector<8x256xf32>
    %81 = arith.mulf %80, %79 : vector<8x256xf32>
    %c1_i32_28 = arith.constant 1 : i32
    %82 = vector.broadcast %c1_i32_28 : i32 to vector<8x1xi32>
    %83 = arith.andi %15, %82 : vector<8x1xi32>
    %c0_i32_29 = arith.constant 0 : i32
    %84 = vector.broadcast %c0_i32_29 : i32 to vector<8x1xi32>
    %85 = arith.cmpi eq, %83, %84 : vector<8x1xi32>
    %c1_i32_30 = arith.constant 1 : i32
    %86 = vector.broadcast %c1_i32_30 : i32 to vector<1x256xi32>
    %87 = arith.andi %14, %86 : vector<1x256xi32>
    %c0_i32_31 = arith.constant 0 : i32
    %88 = vector.broadcast %c0_i32_31 : i32 to vector<1x256xi32>
    %89 = arith.cmpi eq, %87, %88 : vector<1x256xi32>
    %90 = vector.shape_cast %89 : vector<1x256xi1> to vector<1x256xi1>
    %91 = vector.broadcast %90 : vector<1x256xi1> to vector<8x256xi1>
    %92 = arith.select %91, %1, %30 : vector<8x256xi1>, vector<8x256xf32>
    %93 = vector.shape_cast %89 : vector<1x256xi1> to vector<1x256xi1>
    %94 = vector.broadcast %93 : vector<1x256xi1> to vector<8x256xi1>
    %95 = arith.select %94, %63, %81 : vector<8x256xi1>, vector<8x256xf32>
    %96 = vector.shape_cast %85 : vector<8x1xi1> to vector<8x1xi1>
    %97 = vector.broadcast %96 : vector<8x1xi1> to vector<8x256xi1>
    %98 = arith.select %97, %92, %95 : vector<8x256xi1>, vector<8x256xf32>
    %c0_32 = arith.constant 0 : index
    %c0_33 = arith.constant 0 : index
    %c0_34 = arith.constant 0 : index
    %c0_35 = arith.constant 0 : index
    %99 = vector.load %arg5[%c0_32, %c0_33, %c0_34, %c0_35] : memref<1x3x8x256xf32, #tpu.memory_space<vmem>>, vector<1x1x8x256xf32>
    %100 = vector.shape_cast %99 : vector<1x1x8x256xf32> to vector<8x256xf32>
    %101 = vector.shape_cast %98 : vector<8x256xf32> to vector<1x1x8x256xf32>
    tpu.vector_store %arg5[%c0_32, %c0_33, %c0_34, %c0_35], %101 {strides = array<i32>} : memref<1x3x8x256xf32, #tpu.memory_space<vmem>>, vector<1x1x8x256xf32>,
    %102 = vector.broadcast %85 : vector<8x1xi1> to vector<8x256xi1>
    %103 = vector.broadcast %89 : vector<1x256xi1> to vector<8x256xi1>
    %104 = vector.broadcast %102 : vector<8x256xi1> to vector<8x256xi1>
    %105 = vector.broadcast %103 : vector<8x256xi1> to vector<8x256xi1>
    %106 = arith.xori %104, %105 : vector<8x256xi1>
    %cst_36 = arith.constant dense<true> : vector<8x256xi1>
    %107 = arith.xori %106, %cst_36 : vector<8x256xi1>
    %108 = arith.select %107, %66, %1 : vector<8x256xi1>, vector<8x256xf32>
    %c0_37 = arith.constant 0 : index
    %c1 = arith.constant 1 : index
    %c0_38 = arith.constant 0 : index
    %c0_39 = arith.constant 0 : index
    %109 = vector.load %arg5[%c0_37, %c1, %c0_38, %c0_39] : memref<1x3x8x256xf32, #tpu.memory_space<vmem>>, vector<1x1x8x256xf32>
    %110 = vector.shape_cast %109 : vector<1x1x8x256xf32> to vector<8x256xf32>
    %111 = vector.shape_cast %108 : vector<8x256xf32> to vector<1x1x8x256xf32>
    tpu.vector_store %arg5[%c0_37, %c1, %c0_38, %c0_39], %111 {strides = array<i32>} : memref<1x3x8x256xf32, #tpu.memory_space<vmem>>, vector<1x1x8x256xf32>,
    %112 = vector.shape_cast %89 : vector<1x256xi1> to vector<1x256xi1>
    %113 = vector.broadcast %112 : vector<1x256xi1> to vector<8x256xi1>
    %114 = arith.select %113, %81, %63 : vector<8x256xi1>, vector<8x256xf32>
    %115 = vector.shape_cast %89 : vector<1x256xi1> to vector<1x256xi1>
    %116 = vector.broadcast %115 : vector<1x256xi1> to vector<8x256xi1>
    %117 = arith.select %116, %30, %1 : vector<8x256xi1>, vector<8x256xf32>
    %118 = vector.shape_cast %85 : vector<8x1xi1> to vector<8x1xi1>
    %119 = vector.broadcast %118 : vector<8x1xi1> to vector<8x256xi1>
    %120 = arith.select %119, %114, %117 : vector<8x256xi1>, vector<8x256xf32>
    %c0_40 = arith.constant 0 : index
    %c2 = arith.constant 2 : index
    %c0_41 = arith.constant 0 : index
    %c0_42 = arith.constant 0 : index
    %121 = vector.load %arg5[%c0_40, %c2, %c0_41, %c0_42] : memref<1x3x8x256xf32, #tpu.memory_space<vmem>>, vector<1x1x8x256xf32>
    %122 = vector.shape_cast %121 : vector<1x1x8x256xf32> to vector<8x256xf32>
    %123 = vector.shape_cast %120 : vector<8x256xf32> to vector<1x1x8x256xf32>
    tpu.vector_store %arg5[%c0_40, %c2, %c0_41, %c0_42], %123 {strides = array<i32>} : memref<1x3x8x256xf32, #tpu.memory_space<vmem>>, vector<1x1x8x256xf32>,
    return
  }
  func.func @transform_0(%arg0: i32, %arg1: i32) -> (i32, i32, i32, i32) {
    %c0_i32 = arith.constant 0 : i32
    %c0_i32_0 = arith.constant 0 : i32
    %c0_i32_1 = arith.constant 0 : i32
    return %arg0, %c0_i32, %arg1, %c0_i32_0 : i32, i32, i32, i32
  }
  func.func @transform_1(%arg0: i32, %arg1: i32) -> (i32, i32, i32, i32) {
    %c1_i32 = arith.constant 1 : i32
    %0 = arith.muli %arg1, %c1_i32 : i32
    %c1_i32_0 = arith.constant 1 : i32
    %1 = arith.subi %0, %c1_i32_0 : i32
    %c0_i32 = arith.constant 0 : i32
    %2 = arith.maxsi %1, %c0_i32 : i32
    %c0_i32_1 = arith.constant 0 : i32
    %c0_i32_2 = arith.constant 0 : i32
    %c0_i32_3 = arith.constant 0 : i32
    return %arg0, %c0_i32_1, %2, %c0_i32_2 : i32, i32, i32, i32
  }
  func.func @transform_2(%arg0: i32, %arg1: i32) -> (i32, i32, i32, i32) {
    %c1_i32 = arith.constant 1 : i32
    %0 = arith.addi %arg1, %c1_i32 : i32
    %c1_i32_0 = arith.constant 1 : i32
    %1 = arith.muli %0, %c1_i32_0 : i32
    %c1_i32_1 = arith.constant 1 : i32
    %2 = arith.minsi %1, %c1_i32_1 : i32
    %c0_i32 = arith.constant 0 : i32
    %c0_i32_2 = arith.constant 0 : i32
    %c0_i32_3 = arith.constant 0 : i32
    return %arg0, %c0_i32, %2, %c0_i32_2 : i32, i32, i32, i32
  }
  func.func @transform_3(%arg0: i32, %arg1: i32) -> (i32, i32, i32, i32) {
    %c0_i32 = arith.constant 0 : i32
    %c0_i32_0 = arith.constant 0 : i32
    %c0_i32_1 = arith.constant 0 : i32
    return %arg0, %c0_i32, %arg1, %c0_i32_0 : i32, i32, i32, i32
  }
}

</mosaic_0001>

<bundles_post_ra>
// kernel: debayer3x3.1
= control target key start
LH: loop header
LB: loop body
LE: loop exit
PB: predicated region body
PF: predicated region fallthrough
CT: control target
= control target key end

     0   :  { %s1675_s0 = inlined_call_operand.hbm [shape: f32[2,1,16,256], index: 0, kind: input, shape index: {}, may-alias: {0,1,2}]   ;;  %s1676_s1 = inlined_call_operand.hbm [shape: f32[2,1,16,256], index: 1, kind: input, shape index: {}, may-alias: {0,1,2}]   ;;  %s1677_s2 = inlined_call_operand.hbm [shape: f32[2,1,16,256], index: 2, kind: input, shape index: {}, may-alias: {0,1,2}]   ;;  %s1678_s3 = inlined_call_operand.hbm [shape: f32[2,3,16,256], index: 3, kind: output, shape index: {}]  }
   0x1   :  { %1698 = sst [smem:[#allocation24_spill]] %s1676_s1 }
   0x2   :  { %1699 = sst [smem:[#allocation25_spill]] %s1678_s3 }
   0x3   :  { %8 = vsyncpa [#allocation3], 0 }
   0x4   :  { %10 = vsyncpa [#allocation3 + $0x1], 0 }
   0x5   :  { %11 = vsyncpa [#allocation6], 0 }
   0x6   :  { %13 = vsyncpa [#allocation6 + $0x1], 0 }
   0x7   :  { %14 = vsyncpa [#allocation4], 0 }
   0x8   :  { %16 = vsyncpa [#allocation4 + $0x1], 0  ;;  %s1139_s12 = smov 0   ;;  %s1141_s13 = smov 0  }
   0x9   :  { %s1143_s14 = smov 0   ;;  %s1145_s15 = smov 0  }
   0xa   :  { %s1147_s16 = smov 0   ;;  %s1149_s17 = smov 0  }
   0xb   :  { %s1151_s18 = smov 0   ;;  %s1153_s19 = smov 0  }
   0xc   :  { %s1155_s20 = smov 0   ;;  %s1157_s21 = smov 0  }
   0xd   :  { %s1159_s22 = smov 0   ;;  %s1161_s23 = smov 0  }
   0xe   :  { %s1163_s24 = smov 0   ;;  %s1165_s25 = smov 0  }
   0xf LB: > { %1700 = sst [smem:[#allocation13_spill]] %s1075_s17  ;;  %s1208_s26 = sadd.s32 4294967295, %s1107_s25   ;;  %s1107_s25 = sphi %s1165_s25, %s22_s25   ;;  %s1103_s24 = sphi %s1163_s24, %s1766_s24   ;;  %s1099_s23 = sphi %s1161_s23, %s1756_s23   ;;  %s1095_s22 = sphi %s1159_s22, %s1765_s22   ;;  %s1091_s21 = sphi %s1157_s21, %s1755_s21   ;;  %s1087_s20 = sphi %s1155_s20, %s1754_s20   ;;  %s1083_s19 = sphi %s1153_s19, %s1764_s19   ;;  %s1079_s18 = sphi %s1151_s18, %s1763_s18   ;;  %s1075_s17 = sphi %s1149_s17, %s1752_s17   ;;  %s1071_s16 = sphi %s1147_s16, %s1762_s16   ;;  %s1067_s15 = sphi %s1145_s15, %s1761_s15   ;;  %s1063_s14 = sphi %s1143_s14, %s1760_s14   ;;  %s1059_s13 = sphi %s1141_s13, %s1759_s13   ;;  %s1055_s12 = sphi %s1139_s12, %s1758_s12  }
  0x10   : > { %1701 = sst [smem:[#allocation14_spill]] %s1079_s18  ;;  %s31_s27 = sadd.s32 1, %s1099_s23 }
  0x11   : > { %1702 = sst [smem:[#allocation15_spill]] %s1087_s20  ;;  %p32_p0 = scmp.ge.s32.totalorder %s31_s27, 2 }
  0x12   : > { %1703 = sst [smem:[#allocation16_spill]] %s1091_s21  ;;  %s34_s28 = sadd.s32 1, %s1103_s24 }
  0x13   : > { %1704 = sst [smem:[#allocation17_spill]] %s1095_s22  ;;  %p1688_p1 = scmp.eq.s32.totalorder %s1107_s25, 0 }
  0x14   : > { %1705 = sst [smem:[#allocation18_spill]] %s1099_s23  ;;  %p1686_p2 = scmp.eq.s32.totalorder %s1208_s26, 0 }
  0x15   : > { %s1768_s27 = smov (%p32_p0, %s31_s27), 0  ;;  %s1770_s28 = smov (!%p32_p0, %s34_s28), %s1103_s24 }
  0x16   : > { %1706 = sst [smem:[#allocation19_spill]] %s1768_s27  ;;  %s39_s29 = ssub.s32 %s1099_s23, %s1768_s27 }
  0x17   : > { %p36_p3 = scmp.ge.s32.totalorder %s1770_s28, 2  ;;  %s77_s30 = sadd.s32 1, %s1075_s17 }
  0x18   : > { %p84_p4 = scmp.ne.s32.totalorder %s1075_s17, %s1071_s16  ;;  %p90_p6 = scmp.ne.s32.totalorder %s1071_s16, %s1067_s15 }
  0x19   : > { %s1772_s28 = smov (%p36_p3, %s1770_s28), 0  ;;  %p1687_p9 = scmp.lt.s32.totalorder %s1107_s25, 4 }
  0x1a   : > { %1707 = sst [smem:[#allocation20_spill]] %s1772_s28  ;;  %s1224_s4 = ssub.s32 %s1103_s24, %s1772_s28 }
  0x1b   : > { %s1227_s5 = sor.u32 %s39_s29, %s1224_s4  ;;  %p1235_p7 = por %p84_p4, %p1688_p1 }
  0x1c   : > { %p1241_p8 = por %p90_p6, %p1686_p2  ;;  %p1685_p10 = scmp.eq.s32.totalorder %s1224_s4, 0 }
  0x1d   : > { %s700_s8 = sshll.u32 %s1103_s24, 2  ;;  %s197_s9 = sand.u32 1, %s1107_s25  }
  0x1e   : > { %s1709_s7 = scalar_select %p1241_p8, 1, 0 }
  0x1f   : > { %s199_s10 = sand.u32 1, %s1075_s17   ;;  %s1690_s27 = sshll.u32 %s1103_s24, 9 }
  0x20   : > { %1710 = sst [smem:[#allocation21_spill]] %s1709_s7  ;;  %s702_s15 = sshll.u32 %s199_s10, 4 }
  0x21   : > { %s1253_s11 = scalar_select %p1685_p10, %s1075_s17, %s77_s30  }
  0x22   : > { %s201_s29 = scalar_lea.vmem [#allocation5], %s702_s15  ;;  %s1712_s1 = sld [smem:[#allocation24_spill]] }
  0x23   : > { %1711 = sst [smem:[#allocation22_spill]] %s1253_s11  ;;  %s214_s28 = sshll.u32 %s201_s29, 4  ;;  %s215_s28 = int_to_ptr.vmem [resolvable:$true] %s214_s28 }
  0x24   : > { %p1265_p11 = pnand %p1687_p9, %p1235_p7  ;;  %s1271_s30 = scalar_lea.sflag [#allocation6], %s197_s9 }
  0x26   : > { %p869_p3 = pneg %p1265_p11 }
  0x28   : > { %s212_s21 = scalar_lea.hbm %s1712_s1, %s1690_s27 }
  0x29   : > { %s867_s10 = scalar_lea.hbm %s212_s21, 256  ;;  %p873_p10 = scmp.lt.s32.totalorder %s212_s21, %s1712_s1 }
  0x2a   : > { %p868_p0 = scmp.ne.s32.totalorder %s212_s21, %s867_s10 }
  0x2c   : > { %p870_p4 = pnand %p869_p3, %p868_p0 }
  0x2e   : > { %p871_p6 = pneg %p870_p4 }
  0x30   : > { %p876_p2 = pnand %p873_p10, %p871_p6 }
  0x32   : > { %879 = shalt.err (!%p876_p2)
}
  0x33   : > { %s880_s22 = scalar_lea.vmem %s215_s28, 256  ;;  %s1109_s6 = smov [#allocation5]  }
  0x34   : > { %p881_p7 = scmp.ne.s32.totalorder %s215_s28, %s880_s22  ;;  %s885_s29 = sshll.u32 %s1109_s6, 4  ;;  %s886_s29 = int_to_ptr.vmem [resolvable:$false] %s885_s29 }
  0x35   : > { %s887_s9 = scalar_lea.vmem %s886_s29, 512  ;;  %p888_p5 = scmp.lt.s32.totalorder %s215_s28, %s886_s29 }
  0x36   : > { %p883_p9 = pnand %p881_p7, %p869_p3  ;;  %p889_p12 = scmp.lt.s32.totalorder %s887_s9, %s880_s22 }
  0x38   : > { %p884_p1 = pneg %p883_p9  ;;  %p890_p13 = por %p889_p12, %p888_p5 }
  0x3a   : > { %p891_p8 = pnand %p890_p13, %p884_p1 }
  0x3c   : > { %894 = shalt.err (!%p891_p8)
}
  0x3d   : > { %739 = dma.hbm_to_vmem [thread:$0]  (!%p1265_p11), %s212_s21, 256, %s215_s28, %s1271_s30  }
  0x3e   : > { %p1714_p1 = scmp.lt.s32.totalorder %s1107_s25, 5  ;;  %p1715_p2 = scmp.ge.s32.totalorder %s1107_s25, 1 }
  0x3f   : > { %s693_s10 = sadd.s32 4294967294, %s1107_s25   ;;  %s43_s15 = sadd.s32 1, %s1087_s20 }
  0x40   : > { %p1285_p5 = pnand %p1715_p2, %p1714_p1  ;;  %p1717_p8 = scmp.eq.s32.totalorder %s1227_s5, 0 }
  0x41   : > { %p50_p9 = scmp.ne.s32.totalorder %s1087_s20, %s1083_s19  ;;  %p56_p10 = scmp.ne.s32.totalorder %s1083_s19, %s1079_s18 }
  0x42   : > { %s1294_s3 = scalar_select %p1717_p8, %s1087_s20, %s43_s15  }
  0x43   : > { %p150_p12 = scmp.eq.s32.totalorder %s1208_s26, 3  ;;  %p156_p13 = scmp.eq.s32.totalorder %s693_s10, 3 }
  0x44   : > { %1718 = sst [smem:[#allocation23_spill]] %s1294_s3  ;;  %p1719_p0 = scmp.eq.s32.totalorder %s1107_s25, 0 }
  0x45   : > { %p1721_p11 = scmp.eq.s32.totalorder %s1208_s26, 0  ;;  %p1313_p6 = por %p150_p12, %p50_p9 }
  0x46   : > { %p1303_p3 = por %p1719_p0, %p50_p9  ;;  %p1317_p7 = por %p156_p13, %p56_p10 }
  0x47   : > { %p1309_p4 = por %p1721_p11, %p56_p10  ;;  %s176_s6 = sand.u32 1, %s1087_s20  }
  0x48   : > { %s1723_s5 = scalar_select %p1313_p6, 1, 0 }
  0x49   : > { %s1722_s28 = scalar_select %p1309_p4, 1, 0 }
  0x4a   : > { %s1724_s22 = scalar_select %p1317_p7, 1, 0 }
  0x4b   : > { %s699_s29 = sshll.u32 %s1099_s23, 1  ;;  %s698_s9 = sshll.u32 %s176_s6, 4 }
  0x4c   : > { %s186_s10 = sadd.s32 %s700_s8, %s699_s29  ;;  %s180_s27 = scalar_lea.vmem [#allocation2], %s698_s9 }
  0x4d   : > { %s701_s15 = sshll.u32 %s186_s10, 7  ;;  %s190_s1 = sshll.u32 %s180_s27, 4  ;;  %s191_s1 = int_to_ptr.vmem [resolvable:$true] %s190_s1 }
  0x4e   : > { %s188_s17 = scalar_lea.hbm %s1675_s0, %s701_s15  ;;  %p1725_p1 = scmp.lt.s32.totalorder %s1107_s25, 4 }
  0x4f   : > { %s177_s20 = scalar_lea.sflag [#allocation3], %s176_s6  ;;  %s908_s23 = scalar_lea.vmem %s191_s1, 256 }
  0x50   : > { %p1332_p2 = pnand %p1725_p1, %p1303_p3  ;;  %p909_p9 = scmp.ne.s32.totalorder %s191_s1, %s908_s23 }
  0x51   : > { %s1110_s27 = smov [#allocation2]  }
  0x52   : > { %p897_p8 = pneg %p1332_p2  ;;  %s913_s8 = sshll.u32 %s1110_s27, 4  ;;  %s914_s8 = int_to_ptr.vmem [resolvable:$false] %s913_s8 }
  0x53   : > { %s915_s11 = scalar_lea.vmem %s914_s8, 512  ;;  %p916_p13 = scmp.lt.s32.totalorder %s191_s1, %s914_s8 }
  0x54   : > { %p911_p10 = pnand %p909_p9, %p897_p8  ;;  %p917_p0 = scmp.lt.s32.totalorder %s915_s11, %s908_s23 }
  0x56   : > { %p912_p12 = pneg %p911_p10  ;;  %p918_p11 = por %p917_p0, %p916_p13 }
  0x58   : > { %p919_p7 = pnand %p918_p11, %p912_p12 }
  0x5a   : > { %922 = shalt.err (!%p919_p7)
}
  0x5b   : > { %736 = dma.hbm_to_vmem [thread:$0]  (!%p1332_p2), %s188_s17, 256, %s191_s1, %s177_s20  }
  0x5c   : > { %s111_s3 = sadd.s32 1, %s1063_s14  ;;  %p118_p3 = scmp.ne.s32.totalorder %s1063_s14, %s1059_s13 }
  0x5d   : > { %p124_p1 = scmp.ne.s32.totalorder %s1059_s13, %s1055_s12  ;;  %s223_s23 = sand.u32 1, %s1063_s14  }
  0x5e   : > { %p1727_p7 = scmp.eq.s32.totalorder %s1107_s25, 0  ;;  %p1728_p9 = scmp.eq.s32.totalorder %s1208_s26, 0 }
  0x5f   : > { %s707_s21 = sshll.u32 %s223_s23, 4  ;;  %p1730_p12 = scmp.eq.s32.totalorder %s1224_s4, 0 }
  0x60   : > { %p120_p8 = por %p118_p3, %p1727_p7  ;;  %p1350_p10 = por %p124_p1, %p1728_p9 }
  0x61   : > { %s1357_s6 = scalar_select %p1730_p12, %s1063_s14, %s111_s3  }
  0x62   : > { %s1729_s18 = scalar_select %p1350_p10, 1, 0 }
  0x63   : > { %s1731_s29 = sshll.u32 %s1103_s24, 9  ;;  %s225_s10 = scalar_lea.vmem [#allocation7], %s707_s21 }
  0x64   : > { %s1051_s9 = sadd.s32 256, %s1731_s29  ;;  %s238_s15 = sshll.u32 %s225_s10, 4  ;;  %s239_s15 = int_to_ptr.vmem [resolvable:$true] %s238_s15 }
  0x65   : > { %s236_s12 = scalar_lea.hbm %s1677_s2, %s1051_s9  ;;  %p1732_p2 = scmp.lt.s32.totalorder %s1107_s25, 4 }
  0x66   : > { %s923_s27 = scalar_lea.hbm %s236_s12, 256  ;;  %s928_s11 = scalar_lea.hbm %s1677_s2, 1024 }
  0x67   : > { %p1366_p13 = pnand %p1732_p2, %p120_p8  ;;  %p924_p0 = scmp.ne.s32.totalorder %s236_s12, %s923_s27 }
  0x68   : > { %p930_p7 = scmp.lt.s32.totalorder %s928_s11, %s923_s27 }
  0x69   : > { %p925_p11 = pneg %p1366_p13 }
  0x6b   : > { %p926_p3 = pnand %p925_p11, %p924_p0 }
  0x6d   : > { %p927_p1 = pneg %p926_p3 }
  0x6f   : > { %p932_p9 = pnand %p930_p7, %p927_p1 }
  0x71   : > { %935 = shalt.err (!%p932_p9)
}
  0x72   : > { %s936_s3 = scalar_lea.vmem %s239_s15, 256  ;;  %s1111_s23 = smov [#allocation7]  }
  0x73   : > { %p937_p12 = scmp.ne.s32.totalorder %s239_s15, %s936_s3  ;;  %s941_s21 = sshll.u32 %s1111_s23, 4  ;;  %s942_s21 = int_to_ptr.vmem [resolvable:$false] %s941_s21 }
  0x74   : > { %s943_s29 = scalar_lea.vmem %s942_s21, 512  ;;  %p944_p6 = scmp.lt.s32.totalorder %s239_s15, %s942_s21 }
  0x75   : > { %p939_p8 = pnand %p937_p12, %p925_p11  ;;  %p945_p10 = scmp.lt.s32.totalorder %s943_s29, %s936_s3 }
  0x77   : > { %p940_p2 = pneg %p939_p8  ;;  %p946_p4 = por %p945_p10, %p944_p6 }
  0x79   : > { %p947_p0 = pnand %p946_p4, %p940_p2 }
  0x7b   : > { %950 = shalt.err (!%p947_p0)
}
  0x7c   : > { %742 = dma.hbm_to_vmem [thread:$0]  (!%p1366_p13), %s236_s12, 256, %s239_s15, %s1271_s30  }
  0x7d   : > { %247 = sbr.rel (%p1285_p5) target bundleno = 314 (0x13a), region = 32  ;;  %s1381_s9 = sand.u32 (!%p1285_p5), 1, %s1083_s19  }
  0x7e   : > { %s712_s10 = sshll.u32 (!%p1285_p5), %s1381_s9, 4  ;;  %s250_s1 = scalar_lea.sflag (!%p1285_p5), [#allocation3], %s1381_s9 }
  0x7f   : > { %s253_s17 = scalar_lea.vmem (!%p1285_p5), [#allocation2], %s712_s10  ;;  %p1734_p11 = scmp.ne.s32.totalorder (!%p1285_p5), %s1722_s28, 0 }
  0x82   : > { %1034 = dma.done.wait (%p1734_p11), %s250_s1, 256  }
  0x83   : > { %1036 = vsyncadd (%p1734_p11), %s250_s1, 4294967040  ;;  %s1735_s30 = sld [smem:[#allocation21_spill]]  ;;  %s258_s15 = sand.u32 1, %s1208_s26  }
  0x84   : > { %s260_s7 = sand.u32 1, %s1071_s16   ;;  %s259_s20 = scalar_lea.sflag [#allocation6], %s258_s15 }
  0x85   : > { %s1391_s12 = sshll.u32 %s260_s7, 4 }
  0x86   : > { %s262_s27 = scalar_lea.vmem [#allocation5], %s1391_s12 }
  0x89   : > { %p1736_p5 = scmp.ne.s32.totalorder %s1735_s30, 0 }
  0x8b   : > { %1038 = dma.done.wait (%p1736_p5), %s259_s20, 256  }
  0x8c   : > { %1040 = vsyncadd (%p1736_p5), %s259_s20, 4294967040  ;;  %s269_s4 = sand.u32 1, %s1059_s13   ;;  %p1737_p4 = scmp.ne.s32.totalorder %s1729_s18, 0 }
  0x8d   : > { %s714_s28 = sshll.u32 %s269_s4, 4 }
  0x8e   : > { %s271_s8 = scalar_lea.vmem [#allocation7], %s714_s28 }
  0x8f   : > { %1042 = dma.done.wait (%p1737_p4), %s259_s20, 256  }
  0x90   : > { %1044 = vsyncadd (%p1737_p4), %s259_s20, 4294967040  ;;  %s1738_s26 = sld [smem:[#allocation16_spill]]  ;;  %v1404_v1 = vld [vmem:[%s253_s17 + $0x8] sm:$0xff]  ;;  %v1406_v2 = vld [vmem:[%s253_s17] sm:$0xff]  ;;  %s1112_s3 = smov 1   ;;  %v340_v18 = vlaneseq  ;;  %vm1114_vm13 = vmmov 1  }
  0x91   : > { %v314_v3 = vld [vmem:[%s271_s8] sm:$0xff]  ;;  %349 = vrot.lane.b32.xlu1 %v1404_v1, %s1112_s3  ;;  %347 = vrot.lane.b32.xlu0 %v1406_v2, %s1112_s3  ;;  %v315_v5 = vld [vmem:[%s271_s8 + $0x8] sm:$0xff]  ;;  %s1113_s23 = smov 127   ;;  %v449_v25 = vrot.slane %v1406_v2, 1  ;;  %v435_v27 = vrot.slane %v1406_v2, 7  ;;  %v450_v29 = vrot.slane %v1404_v1, 1 }
  0x92   : > { %v334_v4 = vrot.slane %v314_v3, 1  ;;  %v335_v6 = vrot.slane %v315_v5, 1  ;;  %v313_v10 = vld [vmem:[%s262_s27 + $0x8] sm:$0xff]  ;;  %v312_v11 = vld [vmem:[%s262_s27] sm:$0xff]  ;;  %v1427_v19 = vshrl.u32 %v340_v18, 7  ;;  %v1435_v22 = vand.u32 127, %v340_v18 }
  0x93   : > { %v323_v14 = vrot.slane %v313_v10, 7  ;;  %v322_v15 = vrot.slane %v312_v11, 7  ;;  %v436_v31 = vrot.slane %v1404_v1, 7  ;;  %s723_s21 = smul.u32 48, %s1381_s9  ;;  %s1745_s10 = sld [smem:[#allocation17_spill]] }
  0x94   : > { %v1430_v20 = vsub.s32 7, %v1427_v19  ;;  %v1433_v21 = vsub.s32 0, %v1427_v19  ;;  %vm434_vm2 = vcmp.eq.s32.totalorder %v1427_v19, 7  ;;  %vm433_vm3 = vcmp.eq.s32.totalorder %v1427_v19, 0  ;;  %s1746_s27 = sld [smem:[#allocation25_spill]]  ;;  %s538_s28 = scalar_lea.sflag [#allocation4], %s1381_s9 }
  0x95   : > { %362 = vrot.lane.b32.xlu1 %v1404_v1, %s1113_s23  ;;  %360 = vrot.lane.b32.xlu0 %v1406_v2, %s1113_s23  ;;  %v1440_v23 = vadd.s32 128, %v1435_v22  ;;  %vm351_vm4 = vcmp.lt.s32.totalorder %v1435_v22, 1  ;;  %v499_v32 = vand.u32 1, %v1427_v19  ;;  %v501_v33 = vand.u32 1, %v1435_v22  ;;  %s1512_s29 = scalar_lea.vmem [#allocation8], %s723_s21  ;;  %p1747_p3 = scmp.ne.s32.totalorder %s1723_s5, 0 }
  0x96   : > { %p328_p6 = scmp.eq.s32.totalorder %s1738_s26, 1  ;;  %p316_p10 = scmp.eq.s32.totalorder %s1738_s26, 0  ;;  %vm345_vm5 = vcmp.eq.s32.totalorder %v1435_v22, 0  ;;  %vm364_vm6 = vcmp.lt.s32.totalorder %v1435_v22, 127 }
  0x97   : > { %v502_v36 = vand.u32 1, %v1440_v23  ;;  %vm368_vm7 = vcmp.eq.s32.totalorder %v1440_v23, 255  ;;  %vm1471_vm8 = vcmp.eq.s32.totalorder %v499_v32, 0  ;;  %vm1475_vm9 = vcmp.eq.s32.totalorder %v501_v33, 0  ;;  %s719_s17 = sshll.u32 %s1738_s26, 1  ;;  %s553_s7 = sshll.u32 %s1512_s29, 4  ;;  %s1582_s7 = int_to_ptr.vmem [resolvable:$true] %s553_s7 }
  0x98   : > { %s329_s11 = scalar_select %p328_p6, 1, 0  ;;  %vm519_vm11 = vmxor %vm1471_vm8, %vm1475_vm9 }
  0x99   : > { %s317_s18 = scalar_select %p316_p10, 1, 0  ;;  %vm1479_vm10 = vcmp.eq.s32.totalorder %v502_v36, 0  ;;  %vm521_vm14 = vmxor %vm519_vm11, %vm1114_vm13 }
  0x9a   : > { %v330_v0 = vstv %s329_s11  ;;  %vm520_vm12 = vmxor %vm1471_vm8, %vm1479_vm10  ;;  %s724_s1 = smul.u32 12, %s1745_s10  ;;  %s951_s8 = scalar_lea.vmem %s1582_s7, 768 }
  0x9b   : > { %vm331_vm0 = vcmp.eq.s32.totalorder %v330_v0, 1  ;;  %v318_v12 = vstv %s317_s18  ;;  %vm522_vm15 = vmxor %vm520_vm12, %vm1114_vm13  ;;  %p952_p13 = scmp.ne.s32.totalorder %s1582_s7, %s951_s8  ;;  %s1115_s26 = smov [#allocation8]  }
  0x9c   : > { %v1411_v7 = vsel %vm331_vm0, %v314_v3, %v334_v4  ;;  %v1416_v9 = vsel %vm331_vm0, %v315_v5, %v335_v6  ;;  %vm319_vm1 = vcmp.eq.s32.totalorder %v318_v12, 1  ;;  %s550_s30 = sadd.s32 %s724_s1, %s719_s17  ;;  %s955_s11 = sshll.u32 %s1115_s26, 4  ;;  %s956_s11 = int_to_ptr.vmem [resolvable:$false] %s955_s11 }
  0x9d   : > { %v399_v8 = vrot.slane %v1411_v7, 7  ;;  %v400_v13 = vrot.slane %v1416_v9, 7  ;;  %v1419_v16 = vsel %vm319_vm1, %v313_v10, %v323_v14  ;;  %v1421_v17 = vsel %vm319_vm1, %v312_v11, %v322_v15  ;;  %s720_s15 = sshll.u32 %s550_s30, 7  ;;  %p953_p1 = pnand %p952_p13, %p1747_p3 }
  0x9e   : > { %v456_v24 = vrot.slane %v1411_v7, %v1430_v20  ;;  %v442_v26 = vrot.slane %v1421_v17, %v1433_v21  ;;  %v460_v28 = vrot.slane %v1416_v9, %v1430_v20  ;;  %v446_v30 = vrot.slane %v1419_v16, %v1433_v21  ;;  %s1570_s4 = scalar_lea.hbm %s1746_s27, %s720_s15  ;;  %p958_p9 = scmp.lt.s32.totalorder %s1582_s7, %s956_s11 }
  0x9f   : > { %417 = vrot.lane.b32.xlu1 %v399_v8, %s1113_s23  ;;  %403 = vrot.lane.b32.xlu0 %v399_v8, %s1112_s3  ;;  %p954_p7 = pneg %p953_p1 }
  0xa0   : > { %v461_v37 = vsel %vm434_vm2, %v456_v24, %v449_v25  ;;  %v447_v38 = vsel %vm433_vm3, %v442_v26, %v435_v27  ;;  %v462_v39 = vsel %vm434_vm2, %v460_v28, %v450_v29  ;;  %v448_v40 = vsel %vm433_vm3, %v446_v30, %v436_v31 }
  0xa1   : > { %v1483_v47 = vadd.f32 %v461_v37, %v447_v38  ;;  %v1485_v48 = vadd.f32 %v462_v39, %v448_v40 }
  0xa3   : > { %419 = vrot.lane.b32.xlu1 %v400_v13, %s1113_s23  ;;  %405 = vrot.lane.b32.xlu0 %v400_v13, %s1112_s3 }
  0xa7   : > { %381 = vrot.lane.b32.xlu1 %v1419_v16, %s1112_s3  ;;  %379 = vrot.lane.b32.xlu0 %v1421_v17, %s1112_s3  ;;  %s957_s3 = scalar_lea.vmem %s956_s11, 1536 }
  0xa8   : > { %p959_p12 = scmp.lt.s32.totalorder %s957_s3, %s951_s8 }
  0xaa   : > { %p960_p8 = por %p959_p12, %p958_p9 }
  0xab   : > { %389 = vrot.lane.b32.xlu1 %v1419_v16, %s1113_s23  ;;  %387 = vrot.lane.b32.xlu0 %v1421_v17, %s1113_s23 }
  0xac   : > { %p961_p2 = pnand %p960_p8, %p954_p7 }
 0x103   : > { %v350_v34 = vpop.permute.xlu1 %349  ;;  %v348_v35 = vpop.permute.xlu0 %347 }
 0x104   : > { %v353_v41 = vsel %vm351_vm4, %v350_v34, %v348_v35  ;;  %v352_v52 = vsel %vm351_vm4, %v348_v35, %v350_v34 }
 0x105   : > { %v358_v49 = vsel %vm345_vm5, %v1406_v2, %v353_v41 }
 0x107   : > { %v363_v44 = vpop.permute.xlu1 %362  ;;  %v361_v46 = vpop.permute.xlu0 %360 }
 0x108   : > { %v365_v50 = vsel %vm364_vm6, %v361_v46, %v363_v44  ;;  %v366_v51 = vsel %vm364_vm6, %v363_v44, %v361_v46  ;;  %v465_v44 = vmul.f32 0.5, %v1483_v47 }
 0x109   : > { %v374_v53 = vsel %vm368_vm7, %v1404_v1, %v366_v51  ;;  %v375_v54 = vadd.f32 %v365_v50, %v358_v49 }
 0x10a   : > { %v376_v55 = vadd.f32 %v374_v53, %v352_v52 }
 0x10b   : > { %v467_v56 = vadd.f32 %v1483_v47, %v375_v54  ;;  %v471_v36 = vrot.slane %v375_v54, 7  ;;  %v483_v37 = vrot.slane %v375_v54, 1  ;;  %v377_v22 = vmul.f32 0.5, %v375_v54 }
 0x10c   : > { %v468_v59 = vadd.f32 %v1485_v48, %v376_v55  ;;  %v472_v39 = vrot.slane %v376_v55, 7  ;;  %v484_v40 = vrot.slane %v376_v55, 1  ;;  %v378_v23 = vmul.f32 0.5, %v376_v55 }
 0x10d   : > { %v469_v60 = vmul.f32 0.25, %v467_v56  ;;  %v509_v52 = vsel %vm1475_vm9, %v1406_v2, %v377_v22  ;;  %v530_v53 = vsel %vm1475_vm9, %v377_v22, %v1406_v2 }
 0x10e   : > { %v470_v61 = vmul.f32 0.25, %v468_v59  ;;  %v531_v54 = vsel %vm1479_vm10, %v378_v23, %v1404_v1 }
 0x10f   : > { %v523_v62 = vsel %vm521_vm14, %v469_v60, %v1406_v2 }
 0x110   : > { %v524_v3 = vsel %vm522_vm15, %v470_v61, %v1404_v1  ;;  %715 = vst [vmem:[%s1512_s29 + $0x10] sm:$0xff] %v523_v62 }
 0x111   : > { %v418_v57 = vpop.permute.xlu1 %417  ;;  %v404_v58 = vpop.permute.xlu0 %403  ;;  %716 = vst [vmem:[%s1512_s29 + $0x18] sm:$0xff] %v524_v3 }
 0x115   : > { %v420_v63 = vpop.permute.xlu1 %419  ;;  %v406_v0 = vpop.permute.xlu0 %405 }
 0x116   : > { %v421_v4 = vsel %vm364_vm6, %v418_v57, %v420_v63  ;;  %v422_v5 = vsel %vm364_vm6, %v420_v63, %v418_v57  ;;  %v407_v6 = vsel %vm351_vm4, %v404_v58, %v406_v0  ;;  %v408_v11 = vsel %vm351_vm4, %v406_v0, %v404_v58 }
 0x117   : > { %v425_v8 = vrot.slane %v421_v4, 1  ;;  %v426_v10 = vrot.slane %v422_v5, 1  ;;  %v411_v12 = vrot.slane %v408_v11, 1  ;;  %v412_v13 = vrot.slane %v407_v6, 1 }
 0x119   : > { %v430_v14 = vsel %vm368_vm7, %v1416_v9, %v426_v10  ;;  %v382_v15 = vpop.permute.xlu1 %381  ;;  %v380_v18 = vpop.permute.xlu0 %379  ;;  %v415_v24 = vsel %vm345_vm5, %v1411_v7, %v411_v12 }
 0x11a   : > { %v431_v25 = vadd.f32 %v425_v8, %v415_v24  ;;  %v384_v26 = vsel %vm351_vm4, %v382_v15, %v380_v18  ;;  %v432_v27 = vadd.f32 %v430_v14, %v412_v13  ;;  %v383_v32 = vsel %vm351_vm4, %v380_v18, %v382_v15 }
 0x11b   : > { %v385_v30 = vsel %vm345_vm5, %v1421_v17, %v384_v26 }
 0x11c   : > { %v488_v7 = vrot.slane %v431_v25, %v1430_v20  ;;  %v492_v35 = vrot.slane %v432_v27, %v1430_v20 }
 0x11d   : > { %v390_v28 = vpop.permute.xlu1 %389  ;;  %v388_v29 = vpop.permute.xlu0 %387 }
 0x11e   : > { %v391_v9 = vsel %vm364_vm6, %v388_v29, %v390_v28  ;;  %v392_v31 = vsel %vm364_vm6, %v390_v28, %v388_v29  ;;  %v494_v46 = vsel %vm434_vm2, %v492_v35, %v484_v40 }
 0x11f   : > { %v394_v33 = vsel %vm368_vm7, %v1419_v16, %v392_v31  ;;  %v395_v34 = vadd.f32 %v391_v9, %v385_v30  ;;  %v493_v16 = vsel %vm434_vm2, %v488_v7, %v483_v37 }
 0x120   : > { %v396_v17 = vadd.f32 %v394_v33, %v383_v32 }
 0x121   : > { %v476_v38 = vrot.slane %v395_v34, %v1433_v21 }
 0x122   : > { %v480_v41 = vrot.slane %v396_v17, %v1433_v21  ;;  %v466_v21 = vmul.f32 0.5, %v1485_v48  ;;  %v510_v48 = vsel %vm1479_vm10, %v1404_v1, %v378_v23 }
 0x123   : > { %v481_v20 = vsel %vm433_vm3, %v476_v38, %v471_v36 }
 0x124   : > { %v482_v49 = vsel %vm433_vm3, %v480_v41, %v472_v39  ;;  %v495_v50 = vadd.f32 %v493_v16, %v481_v20 }
 0x125   : > { %v496_v51 = vadd.f32 %v494_v46, %v482_v49 }
 0x126   : > { %v497_v47 = vmul.f32 0.25, %v495_v50 }
 0x127   : > { %v498_v19 = vmul.f32 0.25, %v496_v51 }
 0x128   : > { %v511_v2 = vsel %vm1475_vm9, %v465_v44, %v497_v47  ;;  %v528_v55 = vsel %vm1475_vm9, %v497_v47, %v465_v44 }
 0x129   : > { %v512_v56 = vsel %vm1479_vm10, %v466_v21, %v498_v19  ;;  %v515_v57 = vsel %vm1471_vm8, %v509_v52, %v511_v2  ;;  %v529_v1 = vsel %vm1479_vm10, %v498_v19, %v466_v21  ;;  %v532_v58 = vsel %vm1471_vm8, %v528_v55, %v530_v53 }
 0x12a   : > { %v516_v43 = vsel %vm1471_vm8, %v510_v48, %v512_v56  ;;  %517 = vst [vmem:[%s1512_s29] sm:$0xff] %v515_v57  ;;  %v533_v59 = vsel %vm1471_vm8, %v529_v1, %v531_v54  ;;  %717 = vst [vmem:[%s1512_s29 + $0x20] sm:$0xff] %v532_v58 }
 0x12b   : > { %518 = vst [vmem:[%s1512_s29 + $0x8] sm:$0xff] %v516_v43  ;;  %718 = vst [vmem:[%s1512_s29 + $0x28] sm:$0xff] %v533_v59 }
 0x12c   : > { %964 = shalt.err (!%p961_p2)
}
 0x12d   : > { %s965_s18 = scalar_lea.hbm %s1570_s4, 768  ;;  %s969_s29 = scalar_lea.hbm %s1746_s27, 3072 }
 0x12e   : > { %p966_p0 = scmp.ne.s32.totalorder %s1570_s4, %s965_s18  ;;  %p970_p4 = scmp.lt.s32.totalorder %s1570_s4, %s1746_s27 }
 0x12f   : > { %p971_p6 = scmp.lt.s32.totalorder %s969_s29, %s965_s18 }
 0x130   : > { %p967_p11 = pnand %p966_p0, %p1747_p3 }
 0x131   : > { %p972_p10 = por %p971_p6, %p970_p4 }
 0x132   : > { %p968_p5 = pneg %p967_p11 }
 0x134   : > { %p973_p13 = pnand %p972_p10, %p968_p5 }
 0x136   : > { %976 = shalt.err (!%p973_p13)
}
 0x137   : > { %s1116_s17 = smov 256   ;;  %s1117_s30 = smov 512  }
 0x138   : > { %s1118_s15 = smov 16  }
 0x139   : > { %731 = dma.vmem_to_hbm [thread:$0]  (%p1747_p3), %s1582_s7, 768, %s1570_s4, %s538_s28, %s1116_s17, %s1117_s30, %s1118_s15  }
 0x13a PF: > { %s1748_s12 = sld [smem:[#allocation14_spill]]  ;;  %p748_p1 = scmp.ge.s32.totalorder %s1107_s25, 2 }
 0x13b   : > { %p1749_p7 = scmp.ne.s32.totalorder %s1724_s22, 0 }
 0x13d   : > { %p744_p9 = pnand %p748_p1, %p1749_p7 }
 0x13f   : > { %p745_p12 = pneg %p744_p9 }
 0x140   : > { %s568_s20 = sand.u32 1, %s1748_s12  }
 0x141   : > { %s569_s8 = scalar_lea.sflag [#allocation4], %s568_s20 }
 0x142   : > { %1046 = dma.done.wait (%p745_p12), %s569_s8, 768  }
 0x143   : > { %1048 = vsyncadd (%p745_p12), %s569_s8, 4294966528  ;;  %s22_s25 = sadd.s32 1, %s1107_s25   ;;  %s1751_s5 = sld [smem:[#allocation13_spill]] }
 0x144   : > { %p1628_p8 = scmp.ge.s32.totalorder %s22_s25, 6   ;;  %s1752_s17 = sld [smem:[#allocation22_spill]] }
 0x145   : > { %s1753_s9 = sld [smem:[#allocation15_spill]]  ;;  %s1758_s12 = smov %s1059_s13 }
 0x146   : > { %s1754_s20 = sld [smem:[#allocation23_spill]]  ;;  %s1759_s13 = smov %s1063_s14 }
 0x147   : > { %s1755_s21 = sld [smem:[#allocation18_spill]]  ;;  %s1760_s14 = smov %s1357_s6 }
 0x148   : > { %s1756_s23 = sld [smem:[#allocation19_spill]]  ;;  %s1761_s15 = smov %s1071_s16 }
 0x149   : > { %s1757_s7 = sld [smem:[#allocation20_spill]]  ;;  %s1762_s16 = smov %s1751_s5 }
 0x14a   : > { %s1763_s18 = smov %s1083_s19  ;;  %s1765_s22 = smov %s1103_s24 }
 0x14b   : > { %s1764_s19 = smov %s1753_s9  ;;  %21 = sbr.rel (!%p1628_p8) target bundleno = 15 (0xf), region = 103 }
 0x14f   : > { %s1766_s24 = smov %s1757_s7 }
 0x150   :  { %574 = vsyncpa [#allocation3], 1 }
 0x151   :  { %576 = vsyncpa [#allocation3 + $0x1], 1 }
 0x152   :  { %577 = vsyncpa [#allocation6], 1 }
 0x153   :  { %579 = vsyncpa [#allocation6 + $0x1], 1 }
 0x154   :  { %580 = vsyncpa [#allocation4], 1 }
 0x155   :  { %582 = vsyncpa [#allocation4 + $0x1], 1 }

</bundles_post_ra>
